<compile_context>
chip_gen: v7x
topology: tpu7x:2x2x1
jax: 0.10.0
libtpu: 0.0.40
codegen_flags: <defaults>
</compile_context>

<pallas_src>
import jax
import jax.numpy as jnp
from jax.experimental import pallas as pl
from jax.experimental.pallas import tpu as pltpu

EPS = 1e-5


def basic_block_kernel(x_ref, wb1_ref, b1_ref, wb2_ref, b2_ref, o_ref, acc_ref):
    """One image per grid step; activations are lane-dense (H, W*C) tiles.

    x_ref   : (1, H, W*Cin)      input image (also the residual identity)
    wb1_ref : (3, W*Cin, W*C)    conv1 banded weights (BN1 scale folded in)
    b1_ref  : (1, W*C)           BN1 bias, tiled per W position
    wb2_ref : (3, W*C,  W*C)     conv2 banded weights (BN2 scale folded in)
    b2_ref  : (1, W*C)           BN2 bias, tiled per W position
    o_ref   : (1, H, W*C)        output
    acc_ref : (H, W*C) f32       VMEM scratch accumulator
    """
    H = acc_ref.shape[0]
    x2d = x_ref[0]                                   # (H, W*Cin)

    def conv_bn(inp, wb_ref, b_ref):
        # kh = 1 (centre kernel row): row-aligned contribution.
        acc_ref[...] = jnp.dot(inp, wb_ref[1], preferred_element_type=jnp.float32)
        # kh = 0 (kernel row above): input row r contributes to output row r+1;
        # output row 0 gets nothing (zero padding above the image).
        h0 = jnp.dot(inp, wb_ref[0], preferred_element_type=jnp.float32)
        acc_ref[1:H, :] += h0[0:H - 1, :]
        # kh = 2 (kernel row below): input row r contributes to output row r-1;
        # output row H-1 gets nothing (zero padding below the image).
        h2 = jnp.dot(inp, wb_ref[2], preferred_element_type=jnp.float32)
        acc_ref[0:H - 1, :] += h2[1:H, :]
        # BN scale already folded into wb; only the bias add remains.
        return acc_ref[...] + b_ref[...]

    # conv1 -> bn1 -> relu
    h = jnp.maximum(conv_bn(x2d, wb1_ref, b1_ref), 0.0)
    # conv2 -> bn2
    out = conv_bn(h, wb2_ref, b2_ref)
    # residual add (identity = unpadded input block) -> relu
    o_ref[0] = jnp.maximum(out + x2d, 0.0).astype(o_ref.dtype)


def fold_bn(gamma, beta, mean, var, eps=EPS):
    scale = gamma / jnp.sqrt(var + eps)
    bias = beta - mean * scale
    return scale.astype(jnp.float32), bias.astype(jnp.float32)


def build_banded(w_hwio, W):
    """Build per-kernel-row banded matmul weights.

    w_hwio: (3, 3, Cin, Cout) with BN scale already folded in.
    Returns (3, W*Cin, W*Cout) where
      Wb[kh][x_in*Cin+ci, x_out*Cout+co] = w[kh, x_in-x_out+1, ci, co]
    for x_in-x_out+1 in {0,1,2}, else 0.  Zero-padding along W is implicit.
    """
    _, _, Cin, Cout = w_hwio.shape
    x_in = jnp.arange(W)[:, None]                      # (W, 1)
    x_out = jnp.arange(W)[None, :]                     # (1, W)
    kw = x_in - x_out + 1                              # (W, W)
    valid = ((kw >= 0) & (kw <= 2)).astype(w_hwio.dtype)
    kw_c = jnp.clip(kw, 0, 2)
    band = w_hwio[:, kw_c, :, :]                       # (3, W, W, Cin, Cout)
    band = band * valid[None, :, :, None, None]
    band = jnp.transpose(band, (0, 1, 3, 2, 4))        # (3, W, Cin, W, Cout)
    return band.reshape(3, W * Cin, W * Cout)


@jax.jit
def basic_block_forward(x_nchw, params):
    """x_nchw: (N, C, H, W) float32.  Returns (N, C, H, W)."""
    w1, g1, be1, m1, v1, w2, g2, be2, m2, v2 = params
    N, Cin, H, W = x_nchw.shape
    C = w1.shape[0]
    # This BasicBlock variant (stride=1, downsample=None) requires Cin == C.
    assert Cin == C, "no-downsample BasicBlock requires inplanes == planes"

    # NCHW -> lane-dense (N, H, W*C).  (Boundary transpose stays in XLA, fused
    # under this jit; a real NHWC pipeline would not need it.)
    x = jnp.transpose(x_nchw, (0, 2, 3, 1)).reshape(N, H, W * Cin).astype(jnp.float32)

    # Fold BN running stats: scale goes into the conv weights, bias stays.
    s1, b1 = fold_bn(g1, be1, m1, v1)
    s2, b2 = fold_bn(g2, be2, m2, v2)
    w1_hwio = jnp.transpose(w1, (2, 3, 1, 0)).astype(jnp.float32) * s1   # (3,3,Cin,C)
    w2_hwio = jnp.transpose(w2, (2, 3, 1, 0)).astype(jnp.float32) * s2
    # On v6e/v7x: cast activations + banded weights to bf16 here (keeping
    # preferred_element_type=f32 in the kernel) to halve VMEM/HBM bytes.
    wb1 = build_banded(w1_hwio, W)                     # (3, W*Cin, W*C)
    wb2 = build_banded(w2_hwio, W)                     # (3, W*C,  W*C)
    b1t = jnp.tile(b1, W).reshape(1, W * C)
    b2t = jnp.tile(b2, W).reshape(1, W * C)

    WC_in = W * Cin
    WC = W * C

    flops = int(N) * 2 * 3 * 2 * int(H) * WC_in * WC          # 2 convs, 3 taps each
    bytes_accessed = 4 * (2 * int(N) * int(H) * WC             # x in + out
                          + 3 * WC_in * WC + 3 * WC * WC       # banded weights
                          + 2 * WC)                            # biases

    out = pl.pallas_call(
        basic_block_kernel,
        out_shape=jax.ShapeDtypeStruct((N, H, WC), jnp.float32),
        grid_spec=pltpu.PrefetchScalarGridSpec(
            num_scalar_prefetch=0,
            grid=(N,),
            in_specs=[
                pl.BlockSpec((1, H, WC_in), lambda n: (n, 0, 0)),   # per-image x
                pl.BlockSpec((3, WC_in, WC), lambda n: (0, 0, 0)),  # resident weights
                pl.BlockSpec((1, WC), lambda n: (0, 0)),            # resident bias
                pl.BlockSpec((3, WC, WC), lambda n: (0, 0, 0)),
                pl.BlockSpec((1, WC), lambda n: (0, 0)),
            ],
            out_specs=pl.BlockSpec((1, H, WC), lambda n: (n, 0, 0)),
            scratch_shapes=[pltpu.VMEM((H, WC), jnp.float32)],
        ),
        compiler_params=pltpu.CompilerParams(
            dimension_semantics=("parallel",),          # megacore split on v7x
            vmem_limit_bytes=32 * 1024 * 1024,
        ),
        cost_estimate=pl.CostEstimate(
            flops=flops, transcendentals=0, bytes_accessed=bytes_accessed),
    )(x, wb1, b1t, wb2, b2t)

    # Lane-dense (N, H, W*C) -> NCHW for the PyTorch-facing API.
    return jnp.transpose(out.reshape(N, H, W, C), (0, 3, 1, 2))


def reference_forward(x_nchw, params):
    """Pure-JAX reference (lax conv), PyTorch eval-mode semantics."""
    w1, g1, be1, m1, v1, w2, g2, be2, m2, v2 = params

    def conv(x, w):
        return jax.lax.conv_general_dilated(
            x, w, window_strides=(1, 1), padding=((1, 1), (1, 1)),
            dimension_numbers=('NCHW', 'OIHW', 'NCHW'))

    def bn(x, g, b, m, v):
        g, b, m, v = (a[None, :, None, None] for a in (g, b, m, v))
        return (x - m) / jnp.sqrt(v + EPS) * g + b

    out = jax.nn.relu(bn(conv(x_nchw, w1), g1, be1, m1, v1))
    out = bn(conv(out, w2), g2, be2, m2, v2)
    return jax.nn.relu(out + x_nchw)


if __name__ == "__main__":
    key = jax.random.PRNGKey(0)
    N, C, H, W = 2, 4, 16, 16      # inplanes == planes == 4, stride=1, no downsample

    keys = jax.random.split(key, 11)
    x = jax.random.normal(keys[0], (N, C, H, W), jnp.float32)

    w1 = jax.random.normal(keys[1], (C, C, 3, 3), jnp.float32) * 0.1   # conv1 OIHW
    w2 = jax.random.normal(keys[2], (C, C, 3, 3), jnp.float32) * 0.1   # conv2 OIHW
    g1 = 1.0 + 0.1 * jax.random.normal(keys[3], (C,), jnp.float32)
    be1 = 0.1 * jax.random.normal(keys[4], (C,), jnp.float32)
    m1 = 0.1 * jax.random.normal(keys[5], (C,), jnp.float32)
    v1 = jnp.abs(jax.random.normal(keys[6], (C,), jnp.float32)) + 0.5
    g2 = 1.0 + 0.1 * jax.random.normal(keys[7], (C,), jnp.float32)
    be2 = 0.1 * jax.random.normal(keys[8], (C,), jnp.float32)
    m2 = 0.1 * jax.random.normal(keys[9], (C,), jnp.float32)
    v2 = jnp.abs(jax.random.normal(keys[10], (C,), jnp.float32)) + 0.5

    params = (w1, g1, be1, m1, v1, w2, g2, be2, m2, v2)

    out = jax.block_until_ready(basic_block_forward(x, params))
    ref = jax.block_until_ready(reference_forward(x, params))
    max_err = float(jnp.max(jnp.abs(out - ref)))
    assert max_err < 1e-3, f"mismatch vs reference: {max_err}"

    print("KERNEL_OK")
</pallas_src>

<mosaic_0001>
module attributes {stable_mosaic.version = 11 : i64} {
  func.func @basic_block_kernel(%arg0: i32, %arg1: memref<1x16x64xf32, #tpu.memory_space<vmem>>, %arg2: memref<3x64x64xf32, #tpu.memory_space<vmem>>, %arg3: memref<1x64xf32, #tpu.memory_space<vmem>>, %arg4: memref<3x64x64xf32, #tpu.memory_space<vmem>>, %arg5: memref<1x64xf32, #tpu.memory_space<vmem>>, %arg6: memref<1x16x64xf32, #tpu.memory_space<vmem>>, %arg7: memref<16x64xf32, #tpu.memory_space<vmem>>) attributes {dimension_semantics = [#tpu.dimension_semantics<parallel>], iteration_bounds = array<i64: 2>, scalar_prefetch = 0 : i64, scratch_operands = 1 : i64, tpu.core_type = #tpu.core_type<tc>, window_params = [{transform_indices = @transform_0, window_bounds = array<i64: 1, 16, 64>}, {pipeline_mode = #tpu.pipeline_mode<synchronous>, transform_indices = @transform_1, window_bounds = array<i64: 3, 64, 64>}, {pipeline_mode = #tpu.pipeline_mode<synchronous>, transform_indices = @transform_2, window_bounds = array<i64: 1, 64>}, {pipeline_mode = #tpu.pipeline_mode<synchronous>, transform_indices = @transform_3, window_bounds = array<i64: 3, 64, 64>}, {pipeline_mode = #tpu.pipeline_mode<synchronous>, transform_indices = @transform_4, window_bounds = array<i64: 1, 64>}, {transform_indices = @transform_5, window_bounds = array<i64: 1, 16, 64>}]} {
    %c0 = arith.constant 0 : index
    %c0_0 = arith.constant 0 : index
    %c0_1 = arith.constant 0 : index
    %0 = vector.load %arg1[%c0, %c0_0, %c0_1] : memref<1x16x64xf32, #tpu.memory_space<vmem>>, vector<1x16x64xf32>
    %1 = vector.shape_cast %0 : vector<1x16x64xf32> to vector<16x64xf32>
    %c1 = arith.constant 1 : index
    %c0_2 = arith.constant 0 : index
    %c0_3 = arith.constant 0 : index
    %2 = vector.load %arg2[%c1, %c0_2, %c0_3] : memref<3x64x64xf32, #tpu.memory_space<vmem>>, vector<1x64x64xf32>
    %3 = vector.shape_cast %2 : vector<1x64x64xf32> to vector<64x64xf32>
    %cst = arith.constant dense<0.000000e+00> : vector<16x64xf32>
    %4 = tpu.matmul %1, %3, %cst {dimension_numbers = #tpu.dot_dimension_numbers<[1], [0], [0], [1], [0, 0, 1, 1], [], []>} : vector<16x64xf32>, vector<64x64xf32>, vector<16x64xf32> -> vector<16x64xf32>
    %c0_4 = arith.constant 0 : index
    %c0_5 = arith.constant 0 : index
    %5 = vector.load %arg7[%c0_4, %c0_5] : memref<16x64xf32, #tpu.memory_space<vmem>>, vector<16x64xf32>
    tpu.vector_store %arg7[%c0_4, %c0_5], %4 {strides = array<i32>} : memref<16x64xf32, #tpu.memory_space<vmem>>, vector<16x64xf32>,
    %c0_6 = arith.constant 0 : index
    %c0_7 = arith.constant 0 : index
    %c0_8 = arith.constant 0 : index
    %6 = vector.load %arg2[%c0_6, %c0_7, %c0_8] : memref<3x64x64xf32, #tpu.memory_space<vmem>>, vector<1x64x64xf32>
    %7 = vector.shape_cast %6 : vector<1x64x64xf32> to vector<64x64xf32>
    %cst_9 = arith.constant dense<0.000000e+00> : vector<16x64xf32>
    %8 = tpu.matmul %1, %7, %cst_9 {dimension_numbers = #tpu.dot_dimension_numbers<[1], [0], [0], [1], [0, 0, 1, 1], [], []>} : vector<16x64xf32>, vector<64x64xf32>, vector<16x64xf32> -> vector<16x64xf32>
    %c1_10 = arith.constant 1 : index
    %c0_11 = arith.constant 0 : index
    %9 = vector.load %arg7[%c1_10, %c0_11] : memref<16x64xf32, #tpu.memory_space<vmem>>, vector<15x64xf32>
    %10 = vector.extract_strided_slice %8 {offsets = [0, 0], sizes = [15, 64], strides = [1, 1]} : vector<16x64xf32> to vector<15x64xf32>
    %11 = arith.addf %9, %10 : vector<15x64xf32>
    %c1_12 = arith.constant 1 : index
    %c0_13 = arith.constant 0 : index
    %12 = vector.load %arg7[%c1_12, %c0_13] : memref<16x64xf32, #tpu.memory_space<vmem>>, vector<15x64xf32>
    tpu.vector_store %arg7[%c1_12, %c0_13], %11 {strides = array<i32>} : memref<16x64xf32, #tpu.memory_space<vmem>>, vector<15x64xf32>,
    %c2 = arith.constant 2 : index
    %c0_14 = arith.constant 0 : index
    %c0_15 = arith.constant 0 : index
    %13 = vector.load %arg2[%c2, %c0_14, %c0_15] : memref<3x64x64xf32, #tpu.memory_space<vmem>>, vector<1x64x64xf32>
    %14 = vector.shape_cast %13 : vector<1x64x64xf32> to vector<64x64xf32>
    %cst_16 = arith.constant dense<0.000000e+00> : vector<16x64xf32>
    %15 = tpu.matmul %1, %14, %cst_16 {dimension_numbers = #tpu.dot_dimension_numbers<[1], [0], [0], [1], [0, 0, 1, 1], [], []>} : vector<16x64xf32>, vector<64x64xf32>, vector<16x64xf32> -> vector<16x64xf32>
    %c0_17 = arith.constant 0 : index
    %c0_18 = arith.constant 0 : index
    %16 = vector.load %arg7[%c0_17, %c0_18] : memref<16x64xf32, #tpu.memory_space<vmem>>, vector<15x64xf32>
    %17 = vector.extract_strided_slice %15 {offsets = [1, 0], sizes = [15, 64], strides = [1, 1]} : vector<16x64xf32> to vector<15x64xf32>
    %18 = arith.addf %16, %17 : vector<15x64xf32>
    %c0_19 = arith.constant 0 : index
    %c0_20 = arith.constant 0 : index
    %19 = vector.load %arg7[%c0_19, %c0_20] : memref<16x64xf32, #tpu.memory_space<vmem>>, vector<15x64xf32>
    tpu.vector_store %arg7[%c0_19, %c0_20], %18 {strides = array<i32>} : memref<16x64xf32, #tpu.memory_space<vmem>>, vector<15x64xf32>,
    %c0_21 = arith.constant 0 : index
    %c0_22 = arith.constant 0 : index
    %20 = vector.load %arg7[%c0_21, %c0_22] : memref<16x64xf32, #tpu.memory_space<vmem>>, vector<16x64xf32>
    %c0_23 = arith.constant 0 : index
    %c0_24 = arith.constant 0 : index
    %21 = vector.load %arg3[%c0_23, %c0_24] : memref<1x64xf32, #tpu.memory_space<vmem>>, vector<1x64xf32>
    %22 = vector.broadcast %21 : vector<1x64xf32> to vector<16x64xf32>
    %23 = arith.addf %20, %22 : vector<16x64xf32>
    %cst_25 = arith.constant 0.000000e+00 : f32
    %24 = vector.broadcast %cst_25 : f32 to vector<16x64xf32>
    %25 = arith.maximumf %23, %24 : vector<16x64xf32>
    %c1_26 = arith.constant 1 : index
    %c0_27 = arith.constant 0 : index
    %c0_28 = arith.constant 0 : index
    %26 = vector.load %arg4[%c1_26, %c0_27, %c0_28] : memref<3x64x64xf32, #tpu.memory_space<vmem>>, vector<1x64x64xf32>
    %27 = vector.shape_cast %26 : vector<1x64x64xf32> to vector<64x64xf32>
    %cst_29 = arith.constant dense<0.000000e+00> : vector<16x64xf32>
    %28 = tpu.matmul %25, %27, %cst_29 {dimension_numbers = #tpu.dot_dimension_numbers<[1], [0], [0], [1], [0, 0, 1, 1], [], []>} : vector<16x64xf32>, vector<64x64xf32>, vector<16x64xf32> -> vector<16x64xf32>
    %c0_30 = arith.constant 0 : index
    %c0_31 = arith.constant 0 : index
    %29 = vector.load %arg7[%c0_30, %c0_31] : memref<16x64xf32, #tpu.memory_space<vmem>>, vector<16x64xf32>
    tpu.vector_store %arg7[%c0_30, %c0_31], %28 {strides = array<i32>} : memref<16x64xf32, #tpu.memory_space<vmem>>, vector<16x64xf32>,
    %c0_32 = arith.constant 0 : index
    %c0_33 = arith.constant 0 : index
    %c0_34 = arith.constant 0 : index
    %30 = vector.load %arg4[%c0_32, %c0_33, %c0_34] : memref<3x64x64xf32, #tpu.memory_space<vmem>>, vector<1x64x64xf32>
    %31 = vector.shape_cast %30 : vector<1x64x64xf32> to vector<64x64xf32>
    %cst_35 = arith.constant dense<0.000000e+00> : vector<16x64xf32>
    %32 = tpu.matmul %25, %31, %cst_35 {dimension_numbers = #tpu.dot_dimension_numbers<[1], [0], [0], [1], [0, 0, 1, 1], [], []>} : vector<16x64xf32>, vector<64x64xf32>, vector<16x64xf32> -> vector<16x64xf32>
    %c1_36 = arith.constant 1 : index
    %c0_37 = arith.constant 0 : index
    %33 = vector.load %arg7[%c1_36, %c0_37] : memref<16x64xf32, #tpu.memory_space<vmem>>, vector<15x64xf32>
    %34 = vector.extract_strided_slice %32 {offsets = [0, 0], sizes = [15, 64], strides = [1, 1]} : vector<16x64xf32> to vector<15x64xf32>
    %35 = arith.addf %33, %34 : vector<15x64xf32>
    %c1_38 = arith.constant 1 : index
    %c0_39 = arith.constant 0 : index
    %36 = vector.load %arg7[%c1_38, %c0_39] : memref<16x64xf32, #tpu.memory_space<vmem>>, vector<15x64xf32>
    tpu.vector_store %arg7[%c1_38, %c0_39], %35 {strides = array<i32>} : memref<16x64xf32, #tpu.memory_space<vmem>>, vector<15x64xf32>,
    %c2_40 = arith.constant 2 : index
    %c0_41 = arith.constant 0 : index
    %c0_42 = arith.constant 0 : index
    %37 = vector.load %arg4[%c2_40, %c0_41, %c0_42] : memref<3x64x64xf32, #tpu.memory_space<vmem>>, vector<1x64x64xf32>
    %38 = vector.shape_cast %37 : vector<1x64x64xf32> to vector<64x64xf32>
    %cst_43 = arith.constant dense<0.000000e+00> : vector<16x64xf32>
    %39 = tpu.matmul %25, %38, %cst_43 {dimension_numbers = #tpu.dot_dimension_numbers<[1], [0], [0], [1], [0, 0, 1, 1], [], []>} : vector<16x64xf32>, vector<64x64xf32>, vector<16x64xf32> -> vector<16x64xf32>
    %c0_44 = arith.constant 0 : index
    %c0_45 = arith.constant 0 : index
    %40 = vector.load %arg7[%c0_44, %c0_45] : memref<16x64xf32, #tpu.memory_space<vmem>>, vector<15x64xf32>
    %41 = vector.extract_strided_slice %39 {offsets = [1, 0], sizes = [15, 64], strides = [1, 1]} : vector<16x64xf32> to vector<15x64xf32>
    %42 = arith.addf %40, %41 : vector<15x64xf32>
    %c0_46 = arith.constant 0 : index
    %c0_47 = arith.constant 0 : index
    %43 = vector.load %arg7[%c0_46, %c0_47] : memref<16x64xf32, #tpu.memory_space<vmem>>, vector<15x64xf32>
    tpu.vector_store %arg7[%c0_46, %c0_47], %42 {strides = array<i32>} : memref<16x64xf32, #tpu.memory_space<vmem>>, vector<15x64xf32>,
    %c0_48 = arith.constant 0 : index
    %c0_49 = arith.constant 0 : index
    %44 = vector.load %arg7[%c0_48, %c0_49] : memref<16x64xf32, #tpu.memory_space<vmem>>, vector<16x64xf32>
    %c0_50 = arith.constant 0 : index
    %c0_51 = arith.constant 0 : index
    %45 = vector.load %arg5[%c0_50, %c0_51] : memref<1x64xf32, #tpu.memory_space<vmem>>, vector<1x64xf32>
    %46 = vector.broadcast %45 : vector<1x64xf32> to vector<16x64xf32>
    %47 = arith.addf %44, %46 : vector<16x64xf32>
    %48 = arith.addf %47, %1 : vector<16x64xf32>
    %cst_52 = arith.constant 0.000000e+00 : f32
    %49 = vector.broadcast %cst_52 : f32 to vector<16x64xf32>
    %50 = arith.maximumf %48, %49 : vector<16x64xf32>
    %c0_53 = arith.constant 0 : index
    %c0_54 = arith.constant 0 : index
    %c0_55 = arith.constant 0 : index
    %51 = vector.load %arg6[%c0_53, %c0_54, %c0_55] : memref<1x16x64xf32, #tpu.memory_space<vmem>>, vector<1x16x64xf32>
    %52 = vector.shape_cast %51 : vector<1x16x64xf32> to vector<16x64xf32>
    %53 = vector.shape_cast %50 : vector<16x64xf32> to vector<1x16x64xf32>
    tpu.vector_store %arg6[%c0_53, %c0_54, %c0_55], %53 {strides = array<i32>} : memref<1x16x64xf32, #tpu.memory_space<vmem>>, vector<1x16x64xf32>,
    return
  }
  func.func @transform_0(%arg0: i32) -> (i32, i32, i32) {
    %c0_i32 = arith.constant 0 : i32
    %c0_i32_0 = arith.constant 0 : i32
    %c0_i32_1 = arith.constant 0 : i32
    return %arg0, %c0_i32, %c0_i32_0 : i32, i32, i32
  }
  func.func @transform_1(%arg0: i32) -> (i32, i32, i32) {
    %c0_i32 = arith.constant 0 : i32
    %c0_i32_0 = arith.constant 0 : i32
    %c0_i32_1 = arith.constant 0 : i32
    %c0_i32_2 = arith.constant 0 : i32
    return %c0_i32, %c0_i32_0, %c0_i32_1 : i32, i32, i32
  }
  func.func @transform_2(%arg0: i32) -> (i32, i32) {
    %c0_i32 = arith.constant 0 : i32
    %c0_i32_0 = arith.constant 0 : i32
    %c0_i32_1 = arith.constant 0 : i32
    return %c0_i32, %c0_i32_0 : i32, i32
  }
  func.func @transform_3(%arg0: i32) -> (i32, i32, i32) {
    %c0_i32 = arith.constant 0 : i32
    %c0_i32_0 = arith.constant 0 : i32
    %c0_i32_1 = arith.constant 0 : i32
    %c0_i32_2 = arith.constant 0 : i32
    return %c0_i32, %c0_i32_0, %c0_i32_1 : i32, i32, i32
  }
  func.func @transform_4(%arg0: i32) -> (i32, i32) {
    %c0_i32 = arith.constant 0 : i32
    %c0_i32_0 = arith.constant 0 : i32
    %c0_i32_1 = arith.constant 0 : i32
    return %c0_i32, %c0_i32_0 : i32, i32
  }
  func.func @transform_5(%arg0: i32) -> (i32, i32, i32) {
    %c0_i32 = arith.constant 0 : i32
    %c0_i32_0 = arith.constant 0 : i32
    %c0_i32_1 = arith.constant 0 : i32
    return %arg0, %c0_i32, %c0_i32_0 : i32, i32, i32
  }
}

</mosaic_0001>

<bundles_post_ra>
// kernel: tile.13
= control target key start
LH: loop header
LB: loop body
LE: loop exit
PB: predicated region body
PF: predicated region fallthrough
CT: control target
= control target key end

     0   :  { %s28_s0 = inlined_call_operand.vmem [shape: f32[4], index: 0, kind: input, shape index: {}]   ;;  %s29_s1 = inlined_call_operand.vmem [shape: f32[16,4], index: 1, kind: output, shape index: {}]  }
   0x1   :  { %v4_v0 = vld [vmem:[%s28_s0] ss:$0 sm:$0xff] }
   0x2   :  { %5 = vst [vmem:[%s29_s1] sm:$0xff] %v4_v0  ;;  %8 = vst [vmem:[%s29_s1 + $0x8] sm:$0xff] %v4_v0 }

// kernel: tile.14
= control target key start
LH: loop header
LB: loop body
LE: loop exit
PB: predicated region body
PF: predicated region fallthrough
CT: control target
= control target key end

     0   :  { %s131_s10 = smov 60   ;;  %s132_s11 = smov 52   ;;  %vm3_vm0 = vcmask 31744   ;;  %vm9_vm1 = vcmask 523744   ;;  %vm15_vm2 = vcmask 490944   ;;  %vm21_vm3 = vcmask 458144   ;;  %s207_s0 = inlined_call_operand.vmem [shape: f32[16,4], index: 0, kind: input, shape index: {}]   ;;  %s208_s1 = inlined_call_operand.vmem [shape: f32[1,64], index: 1, kind: output, shape index: {}]  }
   0x1   :  { %v101_v0 = vld [vmem:[%s207_s0 + $0xf] sm:$0x1]   ;;  %v103_v1 = vld [vmem:[%s207_s0 + $0xd] sm:$0x1]   ;;  %v102_v2 = vld [vmem:[%s207_s0 + $0xe] sm:$0x1]  }
   0x2   :  { %7 = vrot.lane.b32.xlu0 %v101_v0, %s131_s10  ;;  %19 = vrot.lane.b32.xlu1 %v103_v1, %s132_s11  ;;  %v104_v3 = vld [vmem:[%s207_s0 + $0xc] sm:$0x1]   ;;  %s133_s16 = smov 56   ;;  %s134_s17 = smov 48   ;;  %v105_v4 = vld [vmem:[%s207_s0 + $0xb] sm:$0x1]  }
   0x3   :  { %v106_v5 = vld [vmem:[%s207_s0 + $0xa] sm:$0x1]   ;;  %v2_v6 = vld [vmem:[%s207_s0] sm:$0x1]   ;;  %s135_s24 = smov 44   ;;  %s136_s25 = smov 40  }
   0x4   :  { %4 = vst.msk [vmem:[#allocation0] sm:$0x1] %vm3_vm0, %v2_v6   ;;  %v107_v7 = vld [vmem:[%s207_s0 + $0x9] sm:$0x1]   ;;  %v108_v8 = vld [vmem:[%s207_s0 + $0x8] sm:$0x1]  }
   0x5   :  { %s137_s30 = smov 36   ;;  %s138_s2 = smov 32   ;;  %v109_v9 = vld [vmem:[%s207_s0 + $0x7] sm:$0x1]   ;;  %v110_v10 = vld [vmem:[%s207_s0 + $0x6] sm:$0x1]  }
   0x6   :  { %13 = vrot.lane.b32.xlu0 %v102_v2, %s133_s16  ;;  %25 = vrot.lane.b32.xlu1 %v104_v3, %s134_s17  ;;  %s139_s7 = smov 28   ;;  %s140_s8 = smov 24   ;;  %v111_v11 = vld [vmem:[%s207_s0 + $0x5] sm:$0x1]   ;;  %v112_v12 = vld [vmem:[%s207_s0 + $0x4] sm:$0x1]  }
   0x7   :  { %s141_s13 = smov 20   ;;  %s142_s14 = smov 16   ;;  %v113_v13 = vld [vmem:[%s207_s0 + $0x3] sm:$0x1]   ;;  %v114_v14 = vld [vmem:[%s207_s0 + $0x2] sm:$0x1]  }
   0x8   :  { %s143_s19 = smov 12   ;;  %s144_s20 = smov 8   ;;  %v115_v15 = vld [vmem:[%s207_s0 + $0x1] sm:$0x1]   ;;  %vm27_vm4 = vcmask 425344   ;;  %vm33_vm5 = vcmask 392544  }
   0x9   :  { %s145_s0 = smov 4   ;;  %vm39_vm6 = vcmask 359744   ;;  %vm45_vm7 = vcmask 326944   ;;  %vm51_vm8 = vcmask 294144   ;;  %vm57_vm9 = vcmask 261344  }
   0xa   :  { %31 = vrot.lane.b32.xlu0 %v105_v4, %s135_s24  ;;  %37 = vrot.lane.b32.xlu1 %v106_v5, %s136_s25  ;;  %vm63_vm10 = vcmask 228544   ;;  %vm69_vm11 = vcmask 195744   ;;  %vm75_vm12 = vcmask 162944   ;;  %vm81_vm13 = vcmask 130144  }
   0xb   :  { %vm87_vm14 = vcmask 97344   ;;  %vm93_vm15 = vcmask 64544  }
   0xe   :  { %43 = vrot.lane.b32.xlu0 %v107_v7, %s137_s30  ;;  %49 = vrot.lane.b32.xlu1 %v108_v8, %s138_s2 }
  0x12   :  { %55 = vrot.lane.b32.xlu0 %v109_v9, %s139_s7  ;;  %61 = vrot.lane.b32.xlu1 %v110_v10, %s140_s8 }
  0x16   :  { %67 = vrot.lane.b32.xlu0 %v111_v11, %s141_s13  ;;  %73 = vrot.lane.b32.xlu1 %v112_v12, %s142_s14 }
  0x1a   :  { %79 = vrot.lane.b32.xlu0 %v113_v13, %s143_s19  ;;  %85 = vrot.lane.b32.xlu1 %v114_v14, %s144_s20 }
  0x1e   :  { %91 = vrot.lane.b32.xlu0 %v115_v15, %s145_s0 }
  0x74   :  { %v8_v16 = vpop.permute.xlu0 %7   ;;  %v20_v17 = vpop.permute.xlu1 %19  }
  0x75   :  { %10 = vst.msk [vmem:[#allocation0] sm:$0x1] %vm9_vm1, %v8_v16  }
  0x78   :  { %v14_v18 = vpop.permute.xlu0 %13   ;;  %v26_v19 = vpop.permute.xlu1 %25  }
  0x79   :  { %16 = vst.msk [vmem:[#allocation0] sm:$0x1] %vm15_vm2, %v14_v18  }
  0x7a   :  { %22 = vst.msk [vmem:[#allocation0] sm:$0x1] %vm21_vm3, %v20_v17  }
  0x7b   :  { %28 = vst.msk [vmem:[#allocation0] sm:$0x1] %vm27_vm4, %v26_v19  }
  0x7c   :  { %v32_v20 = vpop.permute.xlu0 %31   ;;  %v38_v21 = vpop.permute.xlu1 %37  }
  0x7d   :  { %34 = vst.msk [vmem:[#allocation0] sm:$0x1] %vm33_vm5, %v32_v20  }
  0x7e   :  { %40 = vst.msk [vmem:[#allocation0] sm:$0x1] %vm39_vm6, %v38_v21  }
  0x80   :  { %v44_v22 = vpop.permute.xlu0 %43   ;;  %v50_v23 = vpop.permute.xlu1 %49  }
  0x81   :  { %46 = vst.msk [vmem:[#allocation0] sm:$0x1] %vm45_vm7, %v44_v22  }
  0x82   :  { %52 = vst.msk [vmem:[#allocation0] sm:$0x1] %vm51_vm8, %v50_v23  }
  0x84   :  { %v56_v24 = vpop.permute.xlu0 %55   ;;  %v62_v25 = vpop.permute.xlu1 %61  }
  0x85   :  { %58 = vst.msk [vmem:[#allocation0] sm:$0x1] %vm57_vm9, %v56_v24  }
  0x86   :  { %64 = vst.msk [vmem:[#allocation0] sm:$0x1] %vm63_vm10, %v62_v25  }
  0x88   :  { %v68_v26 = vpop.permute.xlu0 %67   ;;  %v74_v27 = vpop.permute.xlu1 %73  }
  0x89   :  { %70 = vst.msk [vmem:[#allocation0] sm:$0x1] %vm69_vm11, %v68_v26  }
  0x8a   :  { %76 = vst.msk [vmem:[#allocation0] sm:$0x1] %vm75_vm12, %v74_v27  }
  0x8c   :  { %v80_v28 = vpop.permute.xlu0 %79   ;;  %v86_v29 = vpop.permute.xlu1 %85  }
  0x8d   :  { %82 = vst.msk [vmem:[#allocation0] sm:$0x1] %vm81_vm13, %v80_v28  }
  0x8e   :  { %88 = vst.msk [vmem:[#allocation0] sm:$0x1] %vm87_vm14, %v86_v29  }
  0x90   :  { %v92_v30 = vpop.permute.xlu0 %91  }
  0x91   :  { %94 = vst.msk [vmem:[#allocation0] sm:$0x1] %vm93_vm15, %v92_v30  }
  0x98   :  { %v98_v31 = vld [vmem:[#allocation0] sm:$0x1] }
  0x99   :  { %100 = vst [vmem:[%s208_s1] sm:$0x1] %v98_v31 }

// kernel: basic_block_forward.1
= control target key start
LH: loop header
LB: loop body
LE: loop exit
PB: predicated region body
PF: predicated region fallthrough
CT: control target
= control target key end

     0   :  { %s1246_s18 = smov 0   ;;  %s1460_s0 = inlined_call_operand.vmem [shape: f32[2,16,64], index: 0, kind: input, shape index: {}]   ;;  %s1461_s1 = inlined_call_operand.vmem [shape: f32[3,64,64], index: 1, kind: input, shape index: {}]   ;;  %s1462_s2 = inlined_call_operand.vmem [shape: f32[1,64], index: 2, kind: input, shape index: {}]   ;;  %s1463_s3 = inlined_call_operand.vmem [shape: f32[3,64,64], index: 3, kind: input, shape index: {}]   ;;  %s1464_s4 = inlined_call_operand.vmem [shape: f32[1,64], index: 4, kind: input, shape index: {}]   ;;  %s1465_s5 = inlined_call_operand.vmem [shape: f32[2,16,64], index: 5, kind: output, shape index: {}]  }
   0x1 LB: > { %s871_s19 = sadd.s32 4294967295, %s1214_s18   ;;  %p875_p0 = scmp.ge.s32.totalorder %s1214_s18, 1  ;;  %s1214_s18 = sphi %s1246_s18, %s15_s18  }
   0x2   : > { %p187_p1 = scmp.lt.s32.totalorder %s1214_s18, 3 }
   0x4   : > { %p188_p2 = pnand %p875_p0, %p187_p1 }
   0x5   : > { %v880_v0 = vld [vmem:[%s1461_s1 + $0x40] sm:$0xff] (!%p188_p2)  ;;  %v881_v1 = vld [vmem:[%s1461_s1 + $0x48] sm:$0xff] (!%p188_p2)  ;;  %v882_v2 = vld [vmem:[%s1461_s1 + $0x50] sm:$0xff] (!%p188_p2)  ;;  %p215_p3 = scmp.lt.s32.totalorder (!%p188_p2), %s871_s19, 1  ;;  %vm236_vm0 = vcmask (!%p188_p2), 523264   ;;  %vm408_vm1 = vcmask (!%p188_p2), 522240  }
   0x6   : > { %191 = sbr.rel (%p188_p2) target bundleno = 521 (0x209), region = 40  ;;  %v1104_v3 = vpack.c.bf16 (!%p188_p2), %v881_v1, %v880_v0  ;;  %v883_v4 = vld [vmem:[%s1461_s1 + $0x58] sm:$0xff] (!%p188_p2)  ;;  %v884_v5 = vld [vmem:[%s1461_s1 + $0x60] sm:$0xff] (!%p188_p2)  ;;  %v885_v7 = vld [vmem:[%s1461_s1 + $0x68] sm:$0xff] (!%p188_p2)  ;;  %vm498_vm2 = vcmask (!%p188_p2), 1046528  }
   0x7   : > { %v1108_v6 = vpack.c.bf16 (!%p188_p2), %v883_v4, %v882_v2  ;;  %v320_v8 = vld [vmem:[%s1461_s1] sm:$0xff] (!%p188_p2)  ;;  %v321_v9 = vld [vmem:[%s1461_s1 + $0x8] sm:$0xff] (!%p188_p2)  ;;  %v322_v11 = vld [vmem:[%s1461_s1 + $0x10] sm:$0xff] (!%p188_p2)  ;;  %v1112_v16 = vpack.c.bf16 (!%p188_p2), %v885_v7, %v884_v5 }
   0x8   : > { %1105 = vmatprep.subr.bf16.mxu0 (!%p188_p2), %v1104_v3  ;;  %v1120_v10 = vpack.c.bf16 (!%p188_p2), %v321_v9, %v320_v8  ;;  %v323_v12 = vld [vmem:[%s1461_s1 + $0x18] sm:$0xff] (!%p188_p2)  ;;  %v324_v14 = vld [vmem:[%s1461_s1 + $0x20] sm:$0xff] (!%p188_p2)  ;;  %v325_v15 = vld [vmem:[%s1461_s1 + $0x28] sm:$0xff] (!%p188_p2) }
   0x9   : > { %1107 = vmatpush3.bf16.msra.mxu0 (!%p188_p2), %v1104_v3  ;;  %v1124_v13 = vpack.c.bf16 (!%p188_p2), %v323_v12, %v322_v11  ;;  %v886_v17 = vld [vmem:[%s1461_s1 + $0x70] sm:$0xff] (!%p188_p2)  ;;  %v887_v18 = vld [vmem:[%s1461_s1 + $0x78] sm:$0xff] (!%p188_p2)  ;;  %v1128_v20 = vpack.c.bf16 (!%p188_p2), %v325_v15, %v324_v14  ;;  %v892_v24 = vld [vmem:[%s1461_s1 + $0x80] sm:$0xff] (!%p188_p2) }
   0xa   : > { %1109 = vmatprep.subr.bf16.mxu0 (!%p188_p2), %v1108_v6  ;;  %1121 = vmatprep.subr.bf16.mxu1 (!%p188_p2), %v1120_v10  ;;  %v326_v21 = vld [vmem:[%s1461_s1 + $0x30] sm:$0xff] (!%p188_p2)  ;;  %v327_v22 = vld [vmem:[%s1461_s1 + $0x38] sm:$0xff] (!%p188_p2)  ;;  %v1116_v23 = vpack.c.bf16 (!%p188_p2), %v887_v18, %v886_v17  ;;  %v893_v25 = vld [vmem:[%s1461_s1 + $0x88] sm:$0xff] (!%p188_p2) }
   0xb   : > { %1123 = vmatpush3.bf16.msra.mxu1 (!%p188_p2), %v1120_v10  ;;  %v1132_v26 = vpack.c.bf16 (!%p188_p2), %v327_v22, %v326_v21  ;;  %v1136_v27 = vpack.c.bf16 (!%p188_p2), %v893_v25, %v892_v24  ;;  %v894_v28 = vld [vmem:[%s1461_s1 + $0x90] sm:$0xff] (!%p188_p2)  ;;  %v895_v29 = vld [vmem:[%s1461_s1 + $0x98] sm:$0xff] (!%p188_p2)  ;;  %v896_v32 = vld [vmem:[%s1461_s1 + $0xa0] sm:$0xff] (!%p188_p2) }
   0xc   : > { %1125 = vmatprep.subr.bf16.mxu1 (!%p188_p2), %v1124_v13  ;;  %v1140_v31 = vpack.c.bf16 (!%p188_p2), %v895_v29, %v894_v28  ;;  %v897_v33 = vld [vmem:[%s1461_s1 + $0xa8] sm:$0xff] (!%p188_p2)  ;;  %v898_v35 = vld [vmem:[%s1461_s1 + $0xb0] sm:$0xff] (!%p188_p2)  ;;  %v899_v36 = vld [vmem:[%s1461_s1 + $0xb8] sm:$0xff] (!%p188_p2) }
   0xd   : > { %s1467_s19 = smov (!%p215_p3, %s871_s19), 1  ;;  %1111 = vmatpush3.bf16.msra.mxu0 %v1108_v6  ;;  %v1144_v34 = vpack.c.bf16 %v897_v33, %v896_v32  ;;  %v1148_v37 = vpack.c.bf16 %v899_v36, %v898_v35  ;;  %v903_v38 = vld [vmem:[%s1463_s3 + $0x40] sm:$0xff]  ;;  %v904_v39 = vld [vmem:[%s1463_s3 + $0x48] sm:$0xff]  ;;  %v905_v44 = vld [vmem:[%s1463_s3 + $0x50] sm:$0xff] }
   0xe   : > { %s928_s15 = sshll.u32 %s1467_s19, 4  ;;  %1113 = vmatprep.subr.bf16.mxu0 %v1112_v16  ;;  %v1152_v40 = vpack.c.bf16 %v904_v39, %v903_v38  ;;  %v613_v41 = vld [vmem:[%s1463_s3] sm:$0xff]  ;;  %v614_v42 = vld [vmem:[%s1463_s3 + $0x8] sm:$0xff]  ;;  %v906_v45 = vld [vmem:[%s1463_s3 + $0x58] sm:$0xff] }
   0xf   : > { %s219_s24 = scalar_lea.vmem %s1460_s0, %s928_s15  ;;  %1127 = vmatpush3.bf16.msra.mxu1 %v1124_v13  ;;  %v1168_v43 = vpack.c.bf16 %v614_v42, %v613_v41  ;;  %v1156_v46 = vpack.c.bf16 %v906_v45, %v905_v44  ;;  %v615_v47 = vld [vmem:[%s1463_s3 + $0x10] sm:$0xff]  ;;  %v616_v48 = vld [vmem:[%s1463_s3 + $0x18] sm:$0xff]  ;;  %v907_v50 = vld [vmem:[%s1463_s3 + $0x60] sm:$0xff]  ;;  %s224_s12 = scalar_lea.vmem %s1465_s5, %s928_s15 }
  0x10   : > { %v1304_v19 = vld [vmem:[%s219_s24] sm:$0xff]  ;;  %1129 = vmatprep.subr.bf16.mxu1 %v1128_v20  ;;  %v1328_v30 = vld [vmem:[%s219_s24 + $0x8] sm:$0xff]  ;;  %v1172_v49 = vpack.c.bf16 %v616_v48, %v615_v47  ;;  %v909_v55 = vld [vmem:[%s1463_s3 + $0x70] sm:$0xff] }
  0x11   : > { %1006 = vmatprep.mubr.msk.f32.mxu0 %vm236_vm0, %v1304_v19  ;;  %1025 = vmatprep.mubr.msk.f32.mxu1 %vm236_vm0, %v1304_v19  ;;  %v908_v51 = vld [vmem:[%s1463_s3 + $0x68] sm:$0xff]  ;;  %v617_v52 = vld [vmem:[%s1463_s3 + $0x20] sm:$0xff]  ;;  %v910_v56 = vld [vmem:[%s1463_s3 + $0x78] sm:$0xff] }
  0x12   : > { %1115 = vmatpush3.bf16.msra.mxu0 %v1112_v16  ;;  %v1160_v53 = vpack.c.bf16 %v908_v51, %v907_v50  ;;  %v618_v54 = vld [vmem:[%s1463_s3 + $0x28] sm:$0xff]  ;;  %v1164_v58 = vpack.c.bf16 %v910_v56, %v909_v55  ;;  %v619_v59 = vld [vmem:[%s1463_s3 + $0x30] sm:$0xff]  ;;  %v620_v60 = vld [vmem:[%s1463_s3 + $0x38] sm:$0xff] }
  0x13   : > { %1117 = vmatprep.subr.bf16.mxu0 %v1116_v23  ;;  %1131 = vmatpush3.bf16.msra.mxu1 %v1128_v20  ;;  %v1176_v57 = vpack.c.bf16 %v618_v54, %v617_v52  ;;  %v1180_v61 = vpack.c.bf16 %v620_v60, %v619_v59  ;;  %v915_v62 = vld [vmem:[%s1463_s3 + $0x80] sm:$0xff]  ;;  %v916_v63 = vld [vmem:[%s1463_s3 + $0x88] sm:$0xff]  ;;  %v917_v24 = vld [vmem:[%s1463_s3 + $0x90] sm:$0xff] }
  0x14   : > { %1133 = vmatprep.subr.bf16.mxu1 %v1132_v26  ;;  %v1184_v0 = vpack.c.bf16 %v916_v63, %v915_v62  ;;  %v902_v18 = vld [vmem:[%s1462_s2] ss:$0 sm:$0xff]  ;;  %v918_v25 = vld [vmem:[%s1463_s3 + $0x98] sm:$0xff]  ;;  %v921_v33 = vld [vmem:[%s1463_s3 + $0xb0] sm:$0xff] }
  0x15   : > { %v1188_v28 = vpack.c.bf16 %v918_v25, %v917_v24  ;;  %v919_v29 = vld [vmem:[%s1463_s3 + $0xa0] sm:$0xff] }
  0x16   : > { %1119 = vmatpush3.bf16.msra.mxu0 %v1116_v23 }
  0x17   : > { %1137 = vmatprep.subr.bf16.mxu0 %v1136_v27  ;;  %1135 = vmatpush3.bf16.msra.mxu1 %v1132_v26 }
  0x18   : > { %1153 = vmatprep.subr.bf16.mxu1 %v1152_v40 }
  0x19   : > { %1007 = vmatmul.mubr.msk.f32.vlgmr.msra.gmra.mrb[0].mxu0 %vm236_vm0, %v1328_v30 }
  0x1a   : > { %1139 = vmatpush3.bf16.msra.mxu0 %v1136_v27  ;;  %1044 = vmatprep.mubr.msk.f32.mxu0 %vm236_vm0, %v1304_v19 }
  0x1b   : > { %1141 = vmatprep.subr.bf16.mxu0 %v1140_v31  ;;  %1026 = vmatmul.mubr.msk.f32.vlgmr.msra.gmra.mrb[0].mxu1 %vm236_vm0, %v1328_v30 }
  0x1c   : > { %1155 = vmatpush3.bf16.msra.mxu1 %v1152_v40 }
  0x1d   : > { %1157 = vmatprep.subr.bf16.mxu1 %v1156_v46 }
  0x1e   : > { %1143 = vmatpush3.bf16.msra.mxu0 %v1140_v31  ;;  %v920_v31 = vld [vmem:[%s1463_s3 + $0xa8] sm:$0xff] }
  0x1f   : > { %1145 = vmatprep.subr.bf16.mxu0 %v1144_v34  ;;  %v1192_v32 = vpack.c.bf16 %v920_v31, %v919_v29 }
  0x20   : > { %1159 = vmatpush3.bf16.msra.mxu1 %v1156_v46 }
  0x21   : > { %1161 = vmatprep.subr.bf16.mxu1 %v1160_v53 }
  0x22   : > { %1147 = vmatpush3.bf16.msra.mxu0 %v1144_v34  ;;  %v922_v34 = vld [vmem:[%s1463_s3 + $0xb8] sm:$0xff] }
  0x23   : > { %1149 = vmatprep.subr.bf16.mxu0 %v1148_v37  ;;  %v1196_v35 = vpack.c.bf16 %v922_v34, %v921_v33 }
  0x24   : > { %1163 = vmatpush3.bf16.msra.mxu1 %v1160_v53  ;;  %v925_v53 = vld [vmem:[%s1464_s4] ss:$0 sm:$0xff] }
  0x25   : > { %1165 = vmatprep.subr.bf16.mxu1 %v1164_v58 }
  0x26   : > { %1151 = vmatpush3.bf16.msra.mxu0 %v1148_v37 }
  0x27   : > { %1169 = vmatprep.subr.bf16.mxu0 %v1168_v43 }
  0x28   : > { %1167 = vmatpush3.bf16.msra.mxu1 %v1164_v58 }
  0x29   : > { %1045 = vmatmul.mubr.msk.f32.vlgmr.msra.gmra.mrb[2].mxu0 %vm236_vm0, %v1328_v30  ;;  %1185 = vmatprep.subr.bf16.mxu1 %v1184_v0 }
  0x2a   : > { %1171 = vmatpush3.bf16.msra.mxu0 %v1168_v43 }
  0x2b   : > { %1173 = vmatprep.subr.bf16.mxu0 %v1172_v49 }
  0x2e   : > { %1175 = vmatpush3.bf16.msra.mxu0 %v1172_v49 }
  0x2f   : > { %1177 = vmatprep.subr.bf16.mxu0 %v1176_v57 }
  0x32   : > { %1179 = vmatpush3.bf16.msra.mxu0 %v1176_v57 }
  0x33   : > { %1181 = vmatprep.subr.bf16.mxu0 %v1180_v61 }
  0x36   : > { %1183 = vmatpush3.bf16.msra.mxu0 %v1180_v61 }
  0xec   : > { %v1008_v1 = vpop.f32.mrb[0].mxu0 }
  0xed   : > { %319 = vst.msk [vmem:[#allocation2 + $0x8] sm:$0xff] %vm236_vm0, %v1008_v1  ;;  %v309_v2 = vpop.f32.mrb[1].mxu0 }
  0xee   : > { %318 = vst.msk [vmem:[#allocation2] sm:$0xff] %vm236_vm0, %v309_v2  ;;  %v1027_v3 = vpop.f32.mrb[0].mxu1 }
  0xef   : > { %v394_v4 = vpop.f32.mrb[1].mxu1 }
  0xf4   : > { %v404_v5 = vld [vmem:[#allocation2 + $0x9] sm:$0x7f] }
  0xf5   : > { %v406_v6 = vadd.f32 %v1027_v3, %v404_v5  ;;  %v403_v7 = vld [vmem:[#allocation2 + $0x1] sm:$0xff] }
  0xf6   : > { %v405_v8 = vadd.f32 %v403_v7, %v394_v4 }
  0xf7   : > { %409 = vst.msk [vmem:[#allocation2 + $0x9] sm:$0x7f] %vm408_vm1, %v406_v6 }
  0xf8   : > { %407 = vst.msk [vmem:[#allocation2 + $0x1] sm:$0xff] %vm236_vm0, %v405_v8 }
  0xfc   : > { %v1046_v9 = vpop.f32.mrb[2].mxu0 }
  0xfd   : > { %v500_v10 = vrot.slane %v1046_v9, 1  ;;  %v485_v11 = vpop.f32.mrb[3].mxu0 }
  0xfe   : > { %v499_v12 = vrot.slane %v485_v11, 1 }
  0xff   : > { %v495_v13 = vld [vmem:[#allocation2 + $0x8] sm:$0x7f]  ;;  %v494_v14 = vld [vmem:[#allocation2] sm:$0xff] }
 0x100   : > { %v505_v15 = vadd.f32 %v500_v10, %v495_v13  ;;  %v501_v16 = vsel %vm498_vm2, %v499_v12, %v500_v10 }
 0x101   : > { %v504_v17 = vadd.f32 %v501_v16, %v494_v14 }
 0x102   : > { %507 = vst.msk [vmem:[#allocation2 + $0x8] sm:$0x7f] %vm408_vm1, %v505_v15 }
 0x103   : > { %506 = vst.msk [vmem:[#allocation2] sm:$0xff] %vm236_vm0, %v504_v17 }
 0x109   : > { %v509_v20 = vld [vmem:[#allocation2 + $0x8] sm:$0xff] }
 0x10a   : > { %v508_v21 = vld [vmem:[#allocation2] sm:$0xff]  ;;  %v518_v22 = vadd.f32 %v902_v18, %v509_v20 }
 0x10b   : > { %v517_v23 = vadd.f32 %v902_v18, %v508_v21 }
 0x10c   : > { %v520_v27 = vmax.f32 %v518_v22, 0.0 }
 0x10d   : > { %v519_v26 = vmax.f32 %v517_v23, 0.0 }
 0x10f   : > { %1063 = vmatprep.mubr.msk.f32.mxu1 %vm236_vm0, %v519_v26  ;;  %1082 = vmatprep.mubr.msk.f32.mxu0 %vm236_vm0, %v519_v26 }
 0x110   : > { %1064 = vmatmul.mubr.msk.f32.vlgmr.msra.gmra.mrb[2].mxu1 %vm236_vm0, %v520_v27  ;;  %1083 = vmatmul.mubr.msk.f32.vlgmr.msra.gmra.mrb[4].mxu0 %vm236_vm0, %v520_v27 }
 0x111   : > { %1187 = vmatpush3.bf16.msra.mxu1 %v1184_v0  ;;  %1101 = vmatprep.mubr.msk.f32.mxu1 %vm236_vm0, %v519_v26 }
 0x112   : > { %1189 = vmatprep.subr.bf16.mxu1 %v1188_v28 }
 0x115   : > { %1191 = vmatpush3.bf16.msra.mxu1 %v1188_v28 }
 0x116   : > { %1193 = vmatprep.subr.bf16.mxu1 %v1192_v32 }
 0x119   : > { %1195 = vmatpush3.bf16.msra.mxu1 %v1192_v32 }
 0x11a   : > { %1197 = vmatprep.subr.bf16.mxu1 %v1196_v35 }
 0x11d   : > { %1199 = vmatpush3.bf16.msra.mxu1 %v1196_v35 }
 0x120   : > { %1102 = vmatmul.mubr.msk.f32.vlgmr.msra.gmra.mrb[4].mxu1 %vm236_vm0, %v520_v27 }
 0x1e3   : > { %v1065_v36 = vpop.f32.mrb[2].mxu1  ;;  %v1084_v37 = vpop.f32.mrb[4].mxu0 }
 0x1e4   : > { %612 = vst.msk [vmem:[#allocation2 + $0x8] sm:$0xff] %vm236_vm0, %v1065_v36  ;;  %v602_v38 = vpop.f32.mrb[3].mxu1  ;;  %v687_v39 = vpop.f32.mrb[5].mxu0 }
 0x1e5   : > { %611 = vst.msk [vmem:[#allocation2] sm:$0xff] %vm236_vm0, %v602_v38 }
 0x1eb   : > { %v697_v40 = vld [vmem:[#allocation2 + $0x9] sm:$0x7f] }
 0x1ec   : > { %v699_v41 = vadd.f32 %v1084_v37, %v697_v40  ;;  %v696_v42 = vld [vmem:[#allocation2 + $0x1] sm:$0xff] }
 0x1ed   : > { %v698_v43 = vadd.f32 %v696_v42, %v687_v39 }
 0x1ee   : > { %701 = vst.msk [vmem:[#allocation2 + $0x9] sm:$0x7f] %vm408_vm1, %v699_v41 }
 0x1ef   : > { %700 = vst.msk [vmem:[#allocation2 + $0x1] sm:$0xff] %vm236_vm0, %v698_v43 }
 0x1f3   : > { %v1103_v44 = vpop.f32.mrb[4].mxu1 }
 0x1f4   : > { %v791_v45 = vrot.slane %v1103_v44, 1  ;;  %v777_v46 = vpop.f32.mrb[5].mxu1 }
 0x1f5   : > { %v790_v47 = vrot.slane %v777_v46, 1 }
 0x1f6   : > { %v787_v48 = vld [vmem:[#allocation2 + $0x8] sm:$0x7f]  ;;  %v786_v49 = vld [vmem:[#allocation2] sm:$0xff] }
 0x1f7   : > { %v796_v50 = vadd.f32 %v791_v45, %v787_v48  ;;  %v792_v51 = vsel %vm498_vm2, %v790_v47, %v791_v45 }
 0x1f8   : > { %v795_v52 = vadd.f32 %v792_v51, %v786_v49 }
 0x1f9   : > { %798 = vst.msk [vmem:[#allocation2 + $0x8] sm:$0x7f] %vm408_vm1, %v796_v50 }
 0x1fa   : > { %797 = vst.msk [vmem:[#allocation2] sm:$0xff] %vm236_vm0, %v795_v52 }
 0x200   : > { %v800_v54 = vld [vmem:[#allocation2 + $0x8] sm:$0xff] }
 0x201   : > { %v799_v55 = vld [vmem:[#allocation2] sm:$0xff]  ;;  %v809_v56 = vadd.f32 %v925_v53, %v800_v54 }
 0x202   : > { %v808_v57 = vadd.f32 %v925_v53, %v799_v55 }
 0x203   : > { %v811_v58 = vadd.f32 %v809_v56, %v1328_v30 }
 0x204   : > { %v810_v59 = vadd.f32 %v808_v57, %v1304_v19 }
 0x205   : > { %v813_v60 = vmax.f32 %v811_v58, 0.0 }
 0x206   : > { %v812_v61 = vmax.f32 %v810_v59, 0.0 }
 0x207   : > { %815 = vst.msk [vmem:[%s224_s12 + $0x8] sm:$0xff] %vm236_vm0, %v813_v60 }
 0x208   : > { %814 = vst.msk [vmem:[%s224_s12] sm:$0xff] %vm236_vm0, %v812_v61 }
 0x209 PF: > { %s15_s18 = sadd.s32 1, %s1214_s18  }
 0x20a   : > { %p12_p4 = scmp.ge.s32.totalorder %s15_s18, 4  }
 0x20c   :  { %14 = sbr.rel (!%p12_p4) target bundleno = 1 (0x1), region = 74 }

</bundles_post_ra>
